<compile_context>
chip_gen: v5e
topology: v5e:2x2
jax: 0.10.0
libtpu: 0.0.40
codegen_flags: <defaults>
</compile_context>

<pallas_src>
import functools

import jax
import jax.numpy as jnp
from jax import lax
from jax.experimental import pallas as pl
from jax.experimental.pallas import tpu as pltpu


# ---------------------------------------------------------------------------
# VMEM-capacity-aware tile selection helpers               [review #7, #8, #9]
# ---------------------------------------------------------------------------
def _vmem_bytes():
    """Physical VMEM capacity; conservative 64 MiB fallback (v7x-sized)."""
    try:
        return int(getattr(pltpu.get_tpu_info(), "vmem_capacity_bytes", 64 << 20))
    except Exception:
        return 64 << 20


def _vmem_limit(vmem):
    # Raise the scoped-VMEM limit above the default (16 MiB on v5e, 32 MiB on
    # v6e/v7x) but stay below physical capacity (64 MiB v7x .. 128 MiB others).
    return int(vmem * 3 // 4)


def _pick_fps_batch_tile(B, N, vmem):
    """Batches per FPS grid step: largest Bt <= 8 dividing B whose working set
    fits, preferring >= 2 grid steps so both v7x TensorCores get work. [#6]"""
    budget = max(vmem // 4, 2 << 20)

    def fits(bt):
        # double-buffered (Bt, 3, N) block + (Bt, N) f32 loop carries/temps
        return bt * N * 64 + (1 << 20) <= budget

    cands = [bt for bt in range(1, min(B, 8) + 1) if B % bt == 0 and fits(bt)]
    if not cands:
        return 1
    two_step = [bt for bt in cands if B // bt >= 2]
    return max(two_step) if two_step else max(cands)


def _pick_knn_tile(S, N, k, vmem):
    """S tile for kNN.  ts is the sublane dim of the center/idx blocks so it
    only has to be a multiple of 8 (or all of S).  The byte model counts the
    loop-carried (ts, N) distance matrix, its compare/select temporaries and
    the double-buffered blocks; the iotas are (1, N)/(1, k) and no longer
    scale with ts.                                       [review #1, #8, #9]"""
    budget = max(vmem // 2, 4 << 20)

    def bytes_needed(ts):
        return 12 * ts * N + 24 * N + 16 * ts * k + (1 << 20)

    if bytes_needed(S) <= budget:
        return S
    cands = [ts for ts in range(8, S, 8) if S % ts == 0]
    fitting = [ts for ts in cands if bytes_needed(ts) <= budget]
    if fitting:
        return max(fitting)
    return min(cands) if cands else S


# ---------------------------------------------------------------------------
# Kernel 1: farthest point sampling (pointops.furthestsampling)
# Greedy sequential selection; Bt batches per grid step so the (Bt, N) loop
# state fills vreg sublanes.  All sequential state (current index, running
# min distance, selected indices) lives in fori_loop carries -> one VMEM
# store after the loop.                                       [review #6, #7]
# ---------------------------------------------------------------------------
def _fps_kernel(xyz_ref, idx_ref):
    # xyz_ref: (Bt, 3, N) f32, idx_ref: (Bt, 1, S) i32
    Bt, _, N = xyz_ref.shape
    S = idx_ref.shape[2]
    xyz = xyz_ref[...]                                        # (Bt, 3, N)
    # Per-channel (Bt, N) views keep every loop value 2-D (batch tile on the
    # sublane axis, points on lanes); hoisted out of the sequential loop.
    x0 = xyz[:, 0, :]
    x1 = xyz[:, 1, :]
    x2 = xyz[:, 2, :]
    col = lax.broadcasted_iota(jnp.int32, (1, N), 1)          # point ids
    scol = lax.broadcasted_iota(jnp.int32, (1, S), 1)         # output slots

    def body(i, carry):
        cur, mind, picks = carry          # (Bt,1) i32, (Bt,N) f32, (Bt,S) i32
        sel_mask = col == cur                                 # (Bt, N)
        # Exact masked extraction of the current centers' coordinates.
        c0 = jnp.sum(jnp.where(sel_mask, x0, 0.0), axis=1, keepdims=True)
        c1 = jnp.sum(jnp.where(sel_mask, x1, 0.0), axis=1, keepdims=True)
        c2 = jnp.sum(jnp.where(sel_mask, x2, 0.0), axis=1, keepdims=True)
        d0 = x0 - c0
        d1 = x1 - c1
        d2 = x2 - c2
        d = d0 * d0 + d1 * d1 + d2 * d2                       # (Bt, N)
        mind = jnp.minimum(mind, d)
        # TODO(synk): a single variadic argmax reduce would halve the XLU work
        # of this loop (review #2) but does not lower reliably on all jax
        # versions; keep the max -> masked-min-index fallback (first-index
        # tie-break), which is this loop's remaining bottleneck.
        maxv = jnp.max(mind, axis=1, keepdims=True)           # (Bt, 1)
        sel = jnp.min(jnp.where(mind == maxv, col, N),
                      axis=1, keepdims=True).astype(jnp.int32)
        picks = jnp.where(scol == i, sel, picks)              # (Bt, S)
        return sel, mind, picks

    init = (jnp.zeros((Bt, 1), jnp.int32),                    # seed index 0
            jnp.full((Bt, N), jnp.inf, jnp.float32),          # running min dist
            jnp.zeros((Bt, S), jnp.int32))                    # picks[:, 0] = 0
    _, _, picks = lax.fori_loop(1, S, body, init)
    idx_ref[:, 0, :] = picks                                  # single store


def _fps(xyz_t, n_fps):
    B, _, N = xyz_t.shape
    vmem = _vmem_bytes()
    bt = _pick_fps_batch_tile(B, N, vmem)
    out = pl.pallas_call(
        _fps_kernel,
        out_shape=jax.ShapeDtypeStruct((B, 1, n_fps), jnp.int32),
        grid_spec=pltpu.PrefetchScalarGridSpec(
            num_scalar_prefetch=0,
            grid=(B // bt,),
            in_specs=[pl.BlockSpec((bt, 3, N), lambda b: (b, 0, 0))],
            out_specs=pl.BlockSpec((bt, 1, n_fps), lambda b: (b, 0, 0)),
        ),
        compiler_params=pltpu.CompilerParams(
            dimension_semantics=("parallel",),                # megacore
            vmem_limit_bytes=_vmem_limit(vmem)),              # [review #7]
    )(xyz_t)
    return out[:, 0, :]                                       # (B, S)


# ---------------------------------------------------------------------------
# Kernel 2: k-nearest-neighbour query (pointops.knnquery)
# Exact f32 pairwise squared distances on the VPU (self-distance is exactly
# 0, so the first neighbour is the center itself), then a fori_loop top-k
# whose state (distance matrix, picks) is loop-carried.
#                                                [review #1, #8, #9, #10]
# ---------------------------------------------------------------------------
def _knn_kernel(fps_ref, xyz_ref, idx_ref, *, k):
    # fps_ref: (1, ts, 3) centers, xyz_ref: (1, 3, N) cloud, idx_ref: (1, ts, k)
    ts = fps_ref.shape[1]
    N = xyz_ref.shape[2]
    c = fps_ref[0]                                            # (ts, 3)
    x = xyz_ref[0]                                            # (3, N)
    d0 = jnp.zeros((ts, N), jnp.float32)
    for j in range(3):                       # unrolled; exact f32 on the VPU
        diff = c[:, j:j + 1] - x[j:j + 1, :]                  # (ts,1)-(1,N)
        d0 = d0 + diff * diff
    # (1, N)/(1, k) iotas broadcast inside the selects; nothing (ts, N)-sized
    # besides the carried distance matrix stays live across the loop.    [#1]
    col = lax.broadcasted_iota(jnp.int32, (1, N), 1)
    kcol = lax.broadcasted_iota(jnp.int32, (1, k), 1)

    def body(kk, carry):                 # ascending distance, first-index ties
        d, picks = carry
        # TODO(synk): jnp.argmin would fuse these two XLU scans (review #2) but
        # is not reliably lowerable; this fallback is the loop's bottleneck.
        minv = jnp.min(d, axis=1, keepdims=True)              # (ts, 1)
        sel = jnp.min(jnp.where(d == minv, col, N), axis=1, keepdims=True)
        picks = jnp.where(kcol == kk, sel, picks)             # (ts, k)
        d = jnp.where(col == sel, jnp.inf, d)                 # knock out winner
        return d, picks

    _, picks = lax.fori_loop(0, k, body,
                             (d0, jnp.zeros((ts, k), jnp.int32)),
                             unroll=True)                     # short fixed loop
    idx_ref[0] = picks


def _knn(fps_xyz, xyz_t, k):
    B, S, _ = fps_xyz.shape
    N = xyz_t.shape[2]
    vmem = _vmem_bytes()
    ts = _pick_knn_tile(S, N, k, vmem)
    return pl.pallas_call(
        functools.partial(_knn_kernel, k=k),
        out_shape=jax.ShapeDtypeStruct((B, S, k), jnp.int32),
        grid_spec=pltpu.PrefetchScalarGridSpec(
            num_scalar_prefetch=0,
            grid=(B, S // ts),
            in_specs=[pl.BlockSpec((1, ts, 3), lambda b, s: (b, s, 0)),
                      pl.BlockSpec((1, 3, N), lambda b, s: (b, 0, 0))],
            out_specs=pl.BlockSpec((1, ts, k), lambda b, s: (b, s, 0)),
        ),
        compiler_params=pltpu.CompilerParams(
            dimension_semantics=("parallel", "parallel"),     # [review #1]
            vmem_limit_bytes=_vmem_limit(vmem)),
    )(fps_xyz, xyz_t)


# ---------------------------------------------------------------------------
# construct_graph forward (no learnable parameters in the PyTorch module)
# ---------------------------------------------------------------------------
def construct_graph(xyz, features, n_FPS, n_kNN=20):
    """xyz: (B, N, 3) f32, features: (B, C, N) f32 ->
       (FPS_xyz (B, n_FPS, 3), graph_features (B, 3+C, n_FPS, n_kNN))."""
    xyz = xyz.astype(jnp.float32)
    features = features.astype(jnp.float32)
    xyz_t = jnp.transpose(xyz, (0, 2, 1))                     # (B, 3, N)
    # Concat once at the cheap (3+C, N) point granularity so one gather feeds
    # both the xyz branch and the feature branch of the graph.
    all_feat = jnp.concatenate([xyz_t, features], axis=1)     # (B, 3+C, N)

    center_idx = _fps(xyz_t, n_FPS)                           # (B, S)

    # pointops.gathering / pointops.grouping: the data-dependent gathers stay
    # as XLA fancy indexing (per-neighbour rows are only 12..4*C bytes, so
    # in-kernel DMA gathers would drown in descriptor overhead).
    center_all = jax.vmap(lambda f, i: f[:, i])(all_feat, center_idx)  # (B,3+C,S)
    FPS_xyz = jnp.transpose(center_all[:, :3, :], (0, 2, 1))  # (B, S, 3)

    idx = _knn(FPS_xyz, xyz_t, n_kNN)                         # (B, S, k)

    # [review #5] Grouping + center subtraction is left to XLA so the gather
    # and the broadcast subtract fuse into a single pass over the largest
    # tensor; a dedicated Pallas kernel here forced an extra HBM write+read of
    # grouped_all that no in-kernel tuning recovers (and its one-hot MXU
    # broadcast was weight-load bound).
    grouped_all = jax.vmap(lambda f, i: f[:, i])(all_feat, idx)   # (B, 3+C, S, k)
    graph_features = grouped_all - center_all[:, :, :, None]
    return FPS_xyz, graph_features


if __name__ == "__main__":
    import numpy as np

    key = jax.random.PRNGKey(0)
    B, N, C = 4, 64, 8
    n_FPS, n_kNN = 16, 4
    k_xyz, k_feat = jax.random.split(key)
    xyz = jax.random.normal(k_xyz, (B, N, 3), dtype=jnp.float32)
    features = jax.random.normal(k_feat, (B, C, N), dtype=jnp.float32)

    fwd = jax.jit(functools.partial(construct_graph, n_FPS=n_FPS, n_kNN=n_kNN))
    FPS_xyz, graph_features = fwd(xyz, features)
    jax.block_until_ready((FPS_xyz, graph_features))

    assert FPS_xyz.shape == (B, n_FPS, 3)
    assert graph_features.shape == (B, 3 + C, n_FPS, n_kNN)
    assert bool(jnp.all(jnp.isfinite(FPS_xyz)))
    assert bool(jnp.all(jnp.isfinite(graph_features)))

    # Reference check for FPS (greedy farthest-point sampling, seed index 0).
    xyz_np = np.asarray(xyz)
    fps_np = np.asarray(FPS_xyz)
    for b in range(B):
        mind = np.full((N,), np.inf, np.float32)
        cur, ref_idx = 0, [0]
        for _ in range(1, n_FPS):
            d = ((xyz_np[b] - xyz_np[b, cur]) ** 2).sum(-1).astype(np.float32)
            mind = np.minimum(mind, d)
            cur = int(np.argmax(mind))
            ref_idx.append(cur)
        assert np.allclose(fps_np[b], xyz_np[b, ref_idx], atol=1e-6)

    # Nearest neighbour of each FPS center is the center itself -> zero offset
    # (exact f32 distances make the self-distance exactly 0).
    assert float(jnp.max(jnp.abs(graph_features[:, :3, :, 0]))) < 1e-5

    # kNN sanity: every grouped neighbour lies within the k-th smallest true
    # distance of its center (tie-order-agnostic check).
    gf = np.asarray(graph_features)
    for b in range(B):
        for s in range(n_FPS):
            d_all = ((xyz_np[b] - fps_np[b, s]) ** 2).sum(-1)
            kth = float(np.sort(d_all)[n_kNN - 1])
            off2 = (gf[b, :3, s, :] ** 2).sum(0)
            assert float(off2.max()) <= kth + 1e-4

    print("KERNEL_OK")
</pallas_src>

<mosaic_0001>
module attributes {stable_mosaic.version = 11 : i64} {
  func.func @_fps_kernel(%arg0: i32, %arg1: memref<2x3x64xf32, #tpu.memory_space<vmem>>, %arg2: memref<2x1x16xi32, #tpu.memory_space<vmem>>) attributes {dimension_semantics = [#tpu.dimension_semantics<parallel>], iteration_bounds = array<i64: 2>, scalar_prefetch = 0 : i64, scratch_operands = 0 : i64, tpu.core_type = #tpu.core_type<tc>, window_params = [{transform_indices = @transform_0, window_bounds = array<i64: 2, 3, 64>}, {transform_indices = @transform_1, window_bounds = array<i64: 2, 1, 16>}]} {
    %c0 = arith.constant 0 : index
    %c0_0 = arith.constant 0 : index
    %c0_1 = arith.constant 0 : index
    %0 = vector.load %arg1[%c0, %c0_0, %c0_1] : memref<2x3x64xf32, #tpu.memory_space<vmem>>, vector<2x3x64xf32>
    %1 = vector.extract_strided_slice %0 {offsets = [0, 0, 0], sizes = [2, 1, 64], strides = [1, 1, 1]} : vector<2x3x64xf32> to vector<2x1x64xf32>
    %2 = vector.shape_cast %1 : vector<2x1x64xf32> to vector<2x64xf32>
    %3 = vector.extract_strided_slice %0 {offsets = [0, 1, 0], sizes = [2, 1, 64], strides = [1, 1, 1]} : vector<2x3x64xf32> to vector<2x1x64xf32>
    %4 = vector.shape_cast %3 : vector<2x1x64xf32> to vector<2x64xf32>
    %5 = vector.extract_strided_slice %0 {offsets = [0, 2, 0], sizes = [2, 1, 64], strides = [1, 1, 1]} : vector<2x3x64xf32> to vector<2x1x64xf32>
    %6 = vector.shape_cast %5 : vector<2x1x64xf32> to vector<2x64xf32>
    %7 = tpu.iota {dimensions = array<i32: 1>} : vector<1x64xi32>
    %8 = tpu.iota {dimensions = array<i32: 1>} : vector<1x16xi32>
    %c0_i32 = arith.constant 0 : i32
    %9 = vector.broadcast %c0_i32 : i32 to vector<2x1xi32>
    %cst = arith.constant 0x7F800000 : f32
    %10 = vector.broadcast %cst : f32 to vector<2x64xf32>
    %c0_i32_2 = arith.constant 0 : i32
    %11 = vector.broadcast %c0_i32_2 : i32 to vector<2x16xi32>
    %c1_i32 = arith.constant 1 : i32
    %c15_i32 = arith.constant 15 : i32
    %12 = arith.addi %c1_i32, %c15_i32 : i32
    %c1_i32_3 = arith.constant 1 : i32
    %13:3 = scf.for %arg3 = %c1_i32 to %12 step %c1_i32_3 iter_args(%arg4 = %9, %arg5 = %10, %arg6 = %11) -> (vector<2x1xi32>, vector<2x64xf32>, vector<2x16xi32>)  : i32 {
      %17 = vector.broadcast %7 : vector<1x64xi32> to vector<2x64xi32>
      %18 = vector.broadcast %arg4 : vector<2x1xi32> to vector<2x64xi32>
      %19 = arith.cmpi eq, %17, %18 : vector<2x64xi32>
      %cst_8 = arith.constant 0.000000e+00 : f32
      %20 = vector.broadcast %cst_8 : f32 to vector<2x64xf32>
      %21 = arith.select %19, %2, %20 : vector<2x64xi1>, vector<2x64xf32>
      %cst_9 = arith.constant dense<0.000000e+00> : vector<2xf32>
      %22 = vector.multi_reduction <add>, %21, %cst_9 [1] : vector<2x64xf32> to vector<2xf32>
      %23 = vector.shape_cast %22 : vector<2xf32> to vector<2x1xf32>
      %cst_10 = arith.constant 0.000000e+00 : f32
      %24 = vector.broadcast %cst_10 : f32 to vector<2x64xf32>
      %25 = arith.select %19, %4, %24 : vector<2x64xi1>, vector<2x64xf32>
      %cst_11 = arith.constant dense<0.000000e+00> : vector<2xf32>
      %26 = vector.multi_reduction <add>, %25, %cst_11 [1] : vector<2x64xf32> to vector<2xf32>
      %27 = vector.shape_cast %26 : vector<2xf32> to vector<2x1xf32>
      %cst_12 = arith.constant 0.000000e+00 : f32
      %28 = vector.broadcast %cst_12 : f32 to vector<2x64xf32>
      %29 = arith.select %19, %6, %28 : vector<2x64xi1>, vector<2x64xf32>
      %cst_13 = arith.constant dense<0.000000e+00> : vector<2xf32>
      %30 = vector.multi_reduction <add>, %29, %cst_13 [1] : vector<2x64xf32> to vector<2xf32>
      %31 = vector.shape_cast %30 : vector<2xf32> to vector<2x1xf32>
      %32 = vector.broadcast %23 : vector<2x1xf32> to vector<2x64xf32>
      %33 = arith.subf %2, %32 : vector<2x64xf32>
      %34 = vector.broadcast %27 : vector<2x1xf32> to vector<2x64xf32>
      %35 = arith.subf %4, %34 : vector<2x64xf32>
      %36 = vector.broadcast %31 : vector<2x1xf32> to vector<2x64xf32>
      %37 = arith.subf %6, %36 : vector<2x64xf32>
      %38 = arith.mulf %33, %33 : vector<2x64xf32>
      %39 = arith.mulf %35, %35 : vector<2x64xf32>
      %40 = arith.addf %38, %39 : vector<2x64xf32>
      %41 = arith.mulf %37, %37 : vector<2x64xf32>
      %42 = arith.addf %40, %41 : vector<2x64xf32>
      %43 = arith.minimumf %arg5, %42 : vector<2x64xf32>
      %cst_14 = arith.constant dense<0xFF800000> : vector<2xf32>
      %44 = vector.multi_reduction <maximumf>, %43, %cst_14 [1] : vector<2x64xf32> to vector<2xf32>
      %45 = vector.shape_cast %44 : vector<2xf32> to vector<2x1xf32>
      %46 = vector.broadcast %45 : vector<2x1xf32> to vector<2x64xf32>
      %47 = arith.cmpf oeq, %43, %46 : vector<2x64xf32>
      %c64_i32 = arith.constant 64 : i32
      %48 = vector.shape_cast %7 : vector<1x64xi32> to vector<1x64xi32>
      %49 = vector.broadcast %48 : vector<1x64xi32> to vector<2x64xi32>
      %50 = vector.broadcast %c64_i32 : i32 to vector<2x64xi32>
      %51 = arith.select %47, %49, %50 : vector<2x64xi1>, vector<2x64xi32>
      %cst_15 = arith.constant dense<2147483647> : vector<2xi32>
      %52 = vector.multi_reduction <minsi>, %51, %cst_15 [1] : vector<2x64xi32> to vector<2xi32>
      %53 = vector.shape_cast %52 : vector<2xi32> to vector<2x1xi32>
      %54 = vector.broadcast %arg3 : i32 to vector<1x16xi32>
      %55 = arith.cmpi eq, %8, %54 : vector<1x16xi32>
      %56 = vector.shape_cast %55 : vector<1x16xi1> to vector<1x16xi1>
      %57 = vector.broadcast %56 : vector<1x16xi1> to vector<2x16xi1>
      %58 = vector.shape_cast %53 : vector<2x1xi32> to vector<2x1xi32>
      %59 = vector.broadcast %58 : vector<2x1xi32> to vector<2x16xi32>
      %60 = arith.select %57, %59, %arg6 : vector<2x16xi1>, vector<2x16xi32>
      scf.yield %53, %43, %60 : vector<2x1xi32>, vector<2x64xf32>, vector<2x16xi32>
    }
    %c15_i32_4 = arith.constant 15 : i32
    %c0_5 = arith.constant 0 : index
    %c0_6 = arith.constant 0 : index
    %c0_7 = arith.constant 0 : index
    %14 = vector.load %arg2[%c0_5, %c0_6, %c0_7] : memref<2x1x16xi32, #tpu.memory_space<vmem>>, vector<2x1x16xi32>
    %15 = vector.shape_cast %14 : vector<2x1x16xi32> to vector<2x16xi32>
    %16 = vector.shape_cast %13#2 : vector<2x16xi32> to vector<2x1x16xi32>
    tpu.vector_store %arg2[%c0_5, %c0_6, %c0_7], %16 {strides = array<i32>} : memref<2x1x16xi32, #tpu.memory_space<vmem>>, vector<2x1x16xi32>,
    return
  }
  func.func @transform_0(%arg0: i32) -> (i32, i32, i32) {
    %c0_i32 = arith.constant 0 : i32
    %c0_i32_0 = arith.constant 0 : i32
    %c0_i32_1 = arith.constant 0 : i32
    return %arg0, %c0_i32, %c0_i32_0 : i32, i32, i32
  }
  func.func @transform_1(%arg0: i32) -> (i32, i32, i32) {
    %c0_i32 = arith.constant 0 : i32
    %c0_i32_0 = arith.constant 0 : i32
    %c0_i32_1 = arith.constant 0 : i32
    return %arg0, %c0_i32, %c0_i32_0 : i32, i32, i32
  }
}

module attributes {stable_mosaic.version = 11 : i64} {
  func.func @_knn_kernel(%arg0: i32, %arg1: i32, %arg2: memref<1x16x3xf32, #tpu.memory_space<vmem>>, %arg3: memref<1x3x64xf32, #tpu.memory_space<vmem>>, %arg4: memref<1x16x4xi32, #tpu.memory_space<vmem>>) attributes {dimension_semantics = [#tpu.dimension_semantics<parallel>, #tpu.dimension_semantics<parallel>], iteration_bounds = array<i64: 4, 1>, scalar_prefetch = 0 : i64, scratch_operands = 0 : i64, tpu.core_type = #tpu.core_type<tc>, window_params = [{transform_indices = @transform_0, window_bounds = array<i64: 1, 16, 3>}, {transform_indices = @transform_1, window_bounds = array<i64: 1, 3, 64>}, {transform_indices = @transform_2, window_bounds = array<i64: 1, 16, 4>}]} {
    %c0 = arith.constant 0 : index
    %c0_0 = arith.constant 0 : index
    %c0_1 = arith.constant 0 : index
    %0 = vector.load %arg2[%c0, %c0_0, %c0_1] : memref<1x16x3xf32, #tpu.memory_space<vmem>>, vector<1x16x3xf32>
    %1 = vector.shape_cast %0 : vector<1x16x3xf32> to vector<16x3xf32>
    %c0_2 = arith.constant 0 : index
    %c0_3 = arith.constant 0 : index
    %c0_4 = arith.constant 0 : index
    %2 = vector.load %arg3[%c0_2, %c0_3, %c0_4] : memref<1x3x64xf32, #tpu.memory_space<vmem>>, vector<1x3x64xf32>
    %3 = vector.shape_cast %2 : vector<1x3x64xf32> to vector<3x64xf32>
    %cst = arith.constant 0.000000e+00 : f32
    %4 = vector.broadcast %cst : f32 to vector<16x64xf32>
    %5 = vector.extract_strided_slice %1 {offsets = [0, 0], sizes = [16, 1], strides = [1, 1]} : vector<16x3xf32> to vector<16x1xf32>
    %6 = vector.extract_strided_slice %3 {offsets = [0, 0], sizes = [1, 64], strides = [1, 1]} : vector<3x64xf32> to vector<1x64xf32>
    %7 = vector.broadcast %5 : vector<16x1xf32> to vector<16x64xf32>
    %8 = vector.broadcast %6 : vector<1x64xf32> to vector<16x64xf32>
    %9 = arith.subf %7, %8 : vector<16x64xf32>
    %10 = arith.mulf %9, %9 : vector<16x64xf32>
    %11 = arith.addf %4, %10 : vector<16x64xf32>
    %12 = vector.extract_strided_slice %1 {offsets = [0, 1], sizes = [16, 1], strides = [1, 1]} : vector<16x3xf32> to vector<16x1xf32>
    %13 = vector.extract_strided_slice %3 {offsets = [1, 0], sizes = [1, 64], strides = [1, 1]} : vector<3x64xf32> to vector<1x64xf32>
    %14 = vector.broadcast %12 : vector<16x1xf32> to vector<16x64xf32>
    %15 = vector.broadcast %13 : vector<1x64xf32> to vector<16x64xf32>
    %16 = arith.subf %14, %15 : vector<16x64xf32>
    %17 = arith.mulf %16, %16 : vector<16x64xf32>
    %18 = arith.addf %11, %17 : vector<16x64xf32>
    %19 = vector.extract_strided_slice %1 {offsets = [0, 2], sizes = [16, 1], strides = [1, 1]} : vector<16x3xf32> to vector<16x1xf32>
    %20 = vector.extract_strided_slice %3 {offsets = [2, 0], sizes = [1, 64], strides = [1, 1]} : vector<3x64xf32> to vector<1x64xf32>
    %21 = vector.broadcast %19 : vector<16x1xf32> to vector<16x64xf32>
    %22 = vector.broadcast %20 : vector<1x64xf32> to vector<16x64xf32>
    %23 = arith.subf %21, %22 : vector<16x64xf32>
    %24 = arith.mulf %23, %23 : vector<16x64xf32>
    %25 = arith.addf %18, %24 : vector<16x64xf32>
    %26 = tpu.iota {dimensions = array<i32: 1>} : vector<1x64xi32>
    %27 = tpu.iota {dimensions = array<i32: 1>} : vector<1x4xi32>
    %c0_i32 = arith.constant 0 : i32
    %28 = vector.broadcast %c0_i32 : i32 to vector<16x4xi32>
    %c0_i32_5 = arith.constant 0 : i32
    %cst_6 = arith.constant dense<0x7F800000> : vector<16xf32>
    %29 = vector.multi_reduction <minimumf>, %25, %cst_6 [1] : vector<16x64xf32> to vector<16xf32>
    %30 = vector.shape_cast %29 : vector<16xf32> to vector<16x1xf32>
    %31 = vector.broadcast %30 : vector<16x1xf32> to vector<16x64xf32>
    %32 = arith.cmpf oeq, %25, %31 : vector<16x64xf32>
    %c64_i32 = arith.constant 64 : i32
    %33 = vector.shape_cast %26 : vector<1x64xi32> to vector<1x64xi32>
    %34 = vector.broadcast %33 : vector<1x64xi32> to vector<16x64xi32>
    %35 = vector.broadcast %c64_i32 : i32 to vector<16x64xi32>
    %36 = arith.select %32, %34, %35 : vector<16x64xi1>, vector<16x64xi32>
    %cst_7 = arith.constant dense<2147483647> : vector<16xi32>
    %37 = vector.multi_reduction <minsi>, %36, %cst_7 [1] : vector<16x64xi32> to vector<16xi32>
    %38 = vector.shape_cast %37 : vector<16xi32> to vector<16x1xi32>
    %39 = vector.broadcast %c0_i32_5 : i32 to vector<1x4xi32>
    %40 = arith.cmpi eq, %27, %39 : vector<1x4xi32>
    %41 = vector.shape_cast %40 : vector<1x4xi1> to vector<1x4xi1>
    %42 = vector.broadcast %41 : vector<1x4xi1> to vector<16x4xi1>
    %43 = vector.shape_cast %38 : vector<16x1xi32> to vector<16x1xi32>
    %44 = vector.broadcast %43 : vector<16x1xi32> to vector<16x4xi32>
    %45 = arith.select %42, %44, %28 : vector<16x4xi1>, vector<16x4xi32>
    %46 = vector.broadcast %26 : vector<1x64xi32> to vector<16x64xi32>
    %47 = vector.broadcast %38 : vector<16x1xi32> to vector<16x64xi32>
    %48 = arith.cmpi eq, %46, %47 : vector<16x64xi32>
    %cst_8 = arith.constant 0x7F800000 : f32
    %49 = vector.broadcast %cst_8 : f32 to vector<16x64xf32>
    %50 = arith.select %48, %49, %25 : vector<16x64xi1>, vector<16x64xf32>
    %c1_i32 = arith.constant 1 : i32
    %cst_9 = arith.constant dense<0x7F800000> : vector<16xf32>
    %51 = vector.multi_reduction <minimumf>, %50, %cst_9 [1] : vector<16x64xf32> to vector<16xf32>
    %52 = vector.shape_cast %51 : vector<16xf32> to vector<16x1xf32>
    %53 = vector.broadcast %52 : vector<16x1xf32> to vector<16x64xf32>
    %54 = arith.cmpf oeq, %50, %53 : vector<16x64xf32>
    %c64_i32_10 = arith.constant 64 : i32
    %55 = vector.shape_cast %26 : vector<1x64xi32> to vector<1x64xi32>
    %56 = vector.broadcast %55 : vector<1x64xi32> to vector<16x64xi32>
    %57 = vector.broadcast %c64_i32_10 : i32 to vector<16x64xi32>
    %58 = arith.select %54, %56, %57 : vector<16x64xi1>, vector<16x64xi32>
    %cst_11 = arith.constant dense<2147483647> : vector<16xi32>
    %59 = vector.multi_reduction <minsi>, %58, %cst_11 [1] : vector<16x64xi32> to vector<16xi32>
    %60 = vector.shape_cast %59 : vector<16xi32> to vector<16x1xi32>
    %61 = vector.broadcast %c1_i32 : i32 to vector<1x4xi32>
    %62 = arith.cmpi eq, %27, %61 : vector<1x4xi32>
    %63 = vector.shape_cast %62 : vector<1x4xi1> to vector<1x4xi1>
    %64 = vector.broadcast %63 : vector<1x4xi1> to vector<16x4xi1>
    %65 = vector.shape_cast %60 : vector<16x1xi32> to vector<16x1xi32>
    %66 = vector.broadcast %65 : vector<16x1xi32> to vector<16x4xi32>
    %67 = arith.select %64, %66, %45 : vector<16x4xi1>, vector<16x4xi32>
    %68 = vector.broadcast %26 : vector<1x64xi32> to vector<16x64xi32>
    %69 = vector.broadcast %60 : vector<16x1xi32> to vector<16x64xi32>
    %70 = arith.cmpi eq, %68, %69 : vector<16x64xi32>
    %cst_12 = arith.constant 0x7F800000 : f32
    %71 = vector.broadcast %cst_12 : f32 to vector<16x64xf32>
    %72 = arith.select %70, %71, %50 : vector<16x64xi1>, vector<16x64xf32>
    %c2_i32 = arith.constant 2 : i32
    %cst_13 = arith.constant dense<0x7F800000> : vector<16xf32>
    %73 = vector.multi_reduction <minimumf>, %72, %cst_13 [1] : vector<16x64xf32> to vector<16xf32>
    %74 = vector.shape_cast %73 : vector<16xf32> to vector<16x1xf32>
    %75 = vector.broadcast %74 : vector<16x1xf32> to vector<16x64xf32>
    %76 = arith.cmpf oeq, %72, %75 : vector<16x64xf32>
    %c64_i32_14 = arith.constant 64 : i32
    %77 = vector.shape_cast %26 : vector<1x64xi32> to vector<1x64xi32>
    %78 = vector.broadcast %77 : vector<1x64xi32> to vector<16x64xi32>
    %79 = vector.broadcast %c64_i32_14 : i32 to vector<16x64xi32>
    %80 = arith.select %76, %78, %79 : vector<16x64xi1>, vector<16x64xi32>
    %cst_15 = arith.constant dense<2147483647> : vector<16xi32>
    %81 = vector.multi_reduction <minsi>, %80, %cst_15 [1] : vector<16x64xi32> to vector<16xi32>
    %82 = vector.shape_cast %81 : vector<16xi32> to vector<16x1xi32>
    %83 = vector.broadcast %c2_i32 : i32 to vector<1x4xi32>
    %84 = arith.cmpi eq, %27, %83 : vector<1x4xi32>
    %85 = vector.shape_cast %84 : vector<1x4xi1> to vector<1x4xi1>
    %86 = vector.broadcast %85 : vector<1x4xi1> to vector<16x4xi1>
    %87 = vector.shape_cast %82 : vector<16x1xi32> to vector<16x1xi32>
    %88 = vector.broadcast %87 : vector<16x1xi32> to vector<16x4xi32>
    %89 = arith.select %86, %88, %67 : vector<16x4xi1>, vector<16x4xi32>
    %90 = vector.broadcast %26 : vector<1x64xi32> to vector<16x64xi32>
    %91 = vector.broadcast %82 : vector<16x1xi32> to vector<16x64xi32>
    %92 = arith.cmpi eq, %90, %91 : vector<16x64xi32>
    %cst_16 = arith.constant 0x7F800000 : f32
    %93 = vector.broadcast %cst_16 : f32 to vector<16x64xf32>
    %94 = arith.select %92, %93, %72 : vector<16x64xi1>, vector<16x64xf32>
    %c3_i32 = arith.constant 3 : i32
    %cst_17 = arith.constant dense<0x7F800000> : vector<16xf32>
    %95 = vector.multi_reduction <minimumf>, %94, %cst_17 [1] : vector<16x64xf32> to vector<16xf32>
    %96 = vector.shape_cast %95 : vector<16xf32> to vector<16x1xf32>
    %97 = vector.broadcast %96 : vector<16x1xf32> to vector<16x64xf32>
    %98 = arith.cmpf oeq, %94, %97 : vector<16x64xf32>
    %c64_i32_18 = arith.constant 64 : i32
    %99 = vector.shape_cast %26 : vector<1x64xi32> to vector<1x64xi32>
    %100 = vector.broadcast %99 : vector<1x64xi32> to vector<16x64xi32>
    %101 = vector.broadcast %c64_i32_18 : i32 to vector<16x64xi32>
    %102 = arith.select %98, %100, %101 : vector<16x64xi1>, vector<16x64xi32>
    %cst_19 = arith.constant dense<2147483647> : vector<16xi32>
    %103 = vector.multi_reduction <minsi>, %102, %cst_19 [1] : vector<16x64xi32> to vector<16xi32>
    %104 = vector.shape_cast %103 : vector<16xi32> to vector<16x1xi32>
    %105 = vector.broadcast %c3_i32 : i32 to vector<1x4xi32>
    %106 = arith.cmpi eq, %27, %105 : vector<1x4xi32>
    %107 = vector.shape_cast %106 : vector<1x4xi1> to vector<1x4xi1>
    %108 = vector.broadcast %107 : vector<1x4xi1> to vector<16x4xi1>
    %109 = vector.shape_cast %104 : vector<16x1xi32> to vector<16x1xi32>
    %110 = vector.broadcast %109 : vector<16x1xi32> to vector<16x4xi32>
    %111 = arith.select %108, %110, %89 : vector<16x4xi1>, vector<16x4xi32>
    %112 = vector.broadcast %26 : vector<1x64xi32> to vector<16x64xi32>
    %113 = vector.broadcast %104 : vector<16x1xi32> to vector<16x64xi32>
    %114 = arith.cmpi eq, %112, %113 : vector<16x64xi32>
    %cst_20 = arith.constant 0x7F800000 : f32
    %115 = vector.broadcast %cst_20 : f32 to vector<16x64xf32>
    %116 = arith.select %114, %115, %94 : vector<16x64xi1>, vector<16x64xf32>
    %c4_i32 = arith.constant 4 : i32
    %c0_21 = arith.constant 0 : index
    %c0_22 = arith.constant 0 : index
    %c0_23 = arith.constant 0 : index
    %117 = vector.load %arg4[%c0_21, %c0_22, %c0_23] : memref<1x16x4xi32, #tpu.memory_space<vmem>>, vector<1x16x4xi32>
    %118 = vector.shape_cast %117 : vector<1x16x4xi32> to vector<16x4xi32>
    %119 = vector.shape_cast %111 : vector<16x4xi32> to vector<1x16x4xi32>
    tpu.vector_store %arg4[%c0_21, %c0_22, %c0_23], %119 {strides = array<i32>} : memref<1x16x4xi32, #tpu.memory_space<vmem>>, vector<1x16x4xi32>,
    return
  }
  func.func @transform_0(%arg0: i32, %arg1: i32) -> (i32, i32, i32) {
    %c0_i32 = arith.constant 0 : i32
    %c0_i32_0 = arith.constant 0 : i32
    return %arg0, %arg1, %c0_i32 : i32, i32, i32
  }
  func.func @transform_1(%arg0: i32, %arg1: i32) -> (i32, i32, i32) {
    %c0_i32 = arith.constant 0 : i32
    %c0_i32_0 = arith.constant 0 : i32
    %c0_i32_1 = arith.constant 0 : i32
    return %arg0, %c0_i32, %c0_i32_0 : i32, i32, i32
  }
  func.func @transform_2(%arg0: i32, %arg1: i32) -> (i32, i32, i32) {
    %c0_i32 = arith.constant 0 : i32
    %c0_i32_0 = arith.constant 0 : i32
    return %arg0, %arg1, %c0_i32 : i32, i32, i32
  }
}

</mosaic_0001>

<bundles_post_ra>
// kernel: construct_graph.3
= control target key start
LH: loop header
LB: loop body
LE: loop exit
PB: predicated region body
PF: predicated region fallthrough
CT: control target
= control target key end

     0   :  { %s634_s9 = smov 0   ;;  %s636_s10 = smov 0   ;;  %s718_s0 = inlined_call_operand.vmem [shape: f32[4,16,3], index: 0, kind: input, shape index: {}]   ;;  %s719_s1 = inlined_call_operand.vmem [shape: f32[4,3,64], index: 1, kind: input, shape index: {}]   ;;  %s720_s2 = inlined_call_operand.vmem [shape: s32[4,16,4], index: 2, kind: output, shape index: {}]  }
   0x1   :  { %s638_s11 = smov 0  }
   0x2 LB: > { %s24_s12 = sadd.s32 1, %s610_s10  ;;  %p551_p0 = scmp.ge.s32.totalorder %s614_s11, 1  ;;  %s614_s11 = sphi %s638_s11, %s12_s11   ;;  %s610_s10 = sphi %s636_s10, %s722_s10   ;;  %s606_s9 = sphi %s634_s9, %s721_s9  }
   0x3   : > { %p26_p1 = scmp.ge.s32.totalorder %s24_s12, 4  ;;  %p142_p2 = scmp.lt.s32.totalorder %s614_s11, 5 }
   0x5   : > { %s724_s12 = smov (%p26_p1, %s24_s12), 0  ;;  %p143_p3 = pnand %p551_p0, %p142_p2 }
   0x6   : > { %p177_p4 = scmp.lt.s32.totalorder (!%p143_p3), %s606_s9, 3 }
   0x7   : > { %146 = sbr.rel (%p143_p3) target bundleno = 1603 (0x643), region = 28 }
   0xc   : > { %v616_v0 = vmov 1   ;;  %v617_v1 = vmov 0   ;;  %s726_s9 = smov (!%p177_p4, %s606_s9), 3  ;;  %v618_v2 = vmov 2   ;;  %vm252_vm0 = vcmask 523264  }
   0xd   : > { %589 = vset.pattern.permute.xlu1 %v616_v0  ;;  %588 = vset.pattern.permute.xlu0 %v617_v1  ;;  %s559_s13 = sshll.u32 %s726_s9, 4  ;;  %s554_s17 = sshll.u32 %s726_s9, 2  ;;  %v250_v33 = vlaneseq }
   0xe   : > { %590 = vset.pattern.permute.xlu2 %v618_v2  ;;  %s184_s16 = scalar_lea.vmem %s718_s0, %s559_s13  ;;  %s189_s20 = scalar_lea.vmem %s719_s1, %s554_s17 }
   0xf   : > { %v200_v3 = vld [vmem:[%s184_s16] sm:$0xff]  ;;  %v201_v4 = vld [vmem:[%s184_s16 + $0x8] sm:$0xff]  ;;  %v666_v34 = vand.u32 127, %v250_v33  ;;  %s198_s23 = scalar_lea.vmem %s720_s2, %s559_s13 }
  0x10   : > { %221 = vperm.xlu1 %589, %v200_v3   ;;  %205 = vperm.xlu0 %588, %v200_v3   ;;  %v202_v5 = vld [vmem:[%s189_s20] sm:$0x7] }
  0x11   : > { %236 = vperm.xlu2 %590, %v200_v3   ;;  %v243_v6 = vperm.slane %v202_v5, 2  ;;  %v228_v8 = vperm.slane %v202_v5, 1  ;;  %v213_v9 = vperm.slane %v202_v5, 0  ;;  %vm293_vm11 = vcmp.eq.s32.totalorder %v666_v34, 0 }
  0x12   : > { %vm342_vm12 = vcmp.eq.s32.totalorder %v666_v34, 1 }
  0x18   : > { %225 = vperm.xlu1 %589, %v201_v4   ;;  %210 = vperm.xlu0 %588, %v201_v4  }
  0x19   : > { %240 = vperm.xlu2 %590, %v201_v4  }
  0x20   : > { %591 = vset.pattern.permute.xlu0 %v618_v2 }
  0x6b   : > { %v237_v7 = vpop.permute.xlu2 %236 }
  0x6c   : > { %v244_v10 = vsub.f32 %v237_v7, %v243_v6 }
  0x6e   : > { %v246_v15 = vmul.f32 %v244_v10, %v244_v10 }
  0x73   : > { %v241_v19 = vpop.permute.xlu2 %240 }
  0x74   : > { %v245_v23 = vsub.f32 %v241_v19, %v243_v6 }
  0x76   : > { %v247_v29 = vmul.f32 %v245_v23, %v245_v23 }
  0x82   : > { %v222_v11 = vpop.permute.xlu1 %221  ;;  %v206_v12 = vpop.permute.xlu0 %205 }
  0x83   : > { %v229_v13 = vsub.f32 %v222_v11, %v228_v8  ;;  %v214_v14 = vsub.f32 %v206_v12, %v213_v9 }
  0x85   : > { %v231_v16 = vmul.f32 %v229_v13, %v229_v13  ;;  %v216_v17 = vmul.f32 %v214_v14, %v214_v14 }
  0x87   : > { %v233_v18 = vadd.f32 %v231_v16, %v216_v17 }
  0x89   : > { %v248_v20 = vadd.f32 %v246_v15, %v233_v18 }
  0x8a   : > { %v226_v21 = vpop.permute.xlu1 %225  ;;  %v211_v22 = vpop.permute.xlu0 %210 }
  0x8b   : > { %v230_v24 = vsub.f32 %v226_v21, %v228_v8  ;;  %v215_v25 = vsub.f32 %v211_v22, %v213_v9  ;;  %v253_v26 = vsel %vm252_vm0, %v248_v20, inf }
  0x8c   : > { %254 = vmin.xlane.f32.xlu0 %v253_v26 }
  0x8d   : > { %v232_v27 = vmul.f32 %v230_v24, %v230_v24  ;;  %v217_v28 = vmul.f32 %v215_v25, %v215_v25 }
  0x8f   : > { %v234_v30 = vadd.f32 %v232_v27, %v217_v28 }
  0x91   : > { %v249_v31 = vadd.f32 %v247_v29, %v234_v30 }
  0x93   : > { %v256_v32 = vsel %vm252_vm0, %v249_v31, inf }
  0x94   : > { %257 = vmin.xlane.f32.xlu1 %v256_v32 }
  0xff   : > { %v255_v35 = vpop.xlane.xlu0 %254 }
 0x100   : > { %vm259_vm1 = vcmp.eq.f32.partialorder %v248_v20, %v255_v35 }
 0x101   : > { %v261_v36 = vsel %vm259_vm1, %v666_v34, 64 }
 0x102   : > { %v263_v37 = vsel %vm252_vm0, %v261_v36, 2147483647 }
 0x103   : > { %v265_v38 = vshra.s32 %v263_v37, 16  ;;  %v264_v45 = vand.u32 65535, %v263_v37 }
 0x105   : > { %v267_v39 = vcvt.s32.f32 %v265_v38  ;;  %v266_v47 = vcvt.s32.f32 %v264_v45 }
 0x107   : > { %v258_v40 = vpop.xlane.xlu1 %257  ;;  %268 = vmin.xlane.f32.xlu2 %v267_v39 }
 0x108   : > { %vm260_vm2 = vcmp.eq.f32.partialorder %v249_v31, %v258_v40 }
 0x109   : > { %v262_v41 = vsel %vm260_vm2, %v666_v34, 64 }
 0x10a   : > { %v278_v42 = vsel %vm252_vm0, %v262_v41, 2147483647 }
 0x10b   : > { %v280_v43 = vshra.s32 %v278_v42, 16  ;;  %v279_v49 = vand.u32 65535, %v278_v42 }
 0x10d   : > { %v282_v44 = vcvt.s32.f32 %v280_v43  ;;  %v281_v51 = vcvt.s32.f32 %v279_v49 }
 0x10f   : > { %283 = vmin.xlane.f32.xlu2 %v282_v44 }
 0x17a   : > { %v269_v46 = vpop.xlane.xlu2 %268 }
 0x17b   : > { %vm270_vm3 = vcmp.eq.f32.partialorder %v267_v39, %v269_v46  ;;  %v275_v53 = vcvt.f32.s32 %v269_v46 }
 0x17c   : > { %v271_v48 = vsel %vm270_vm3, %v266_v47, inf }
 0x17d   : > { %272 = vmin.xlane.f32.xlu0 %v271_v48  ;;  %v276_v55 = vshll.u32 %v275_v53, 16 }
 0x182   : > { %v284_v50 = vpop.xlane.xlu2 %283 }
 0x183   : > { %vm285_vm4 = vcmp.eq.f32.partialorder %v282_v44, %v284_v50  ;;  %v290_v58 = vcvt.f32.s32 %v284_v50 }
 0x184   : > { %v286_v52 = vsel %vm285_vm4, %v281_v51, inf  ;;  %vm391_vm4 = vcmp.eq.s32.totalorder %v666_v34, 2 }
 0x185   : > { %287 = vmin.xlane.f32.xlu1 %v286_v52  ;;  %v291_v62 = vshll.u32 %v290_v58, 16 }
 0x1f0   : > { %v273_v54 = vpop.xlane.xlu0 %272 }
 0x1f1   : > { %v274_v56 = vcvt.f32.s32 %v273_v54 }
 0x1f3   : > { %v277_v57 = vadd.s32 %v276_v55, %v274_v56 }
 0x1f5   : > { %vm298_vm5 = vcmp.eq.s32.totalorder %v666_v34, %v277_v57  ;;  %v296_v26 = vsel %vm293_vm11, %v277_v57, 0 }
 0x1f6   : > { %v300_v59 = vsel %vm298_vm5, inf, %v248_v20 }
 0x1f7   : > { %v302_v60 = vsel %vm252_vm0, %v300_v59, inf }
 0x1f8   : > { %v288_v61 = vpop.xlane.xlu1 %287  ;;  %303 = vmin.xlane.f32.xlu2 %v302_v60 }
 0x1f9   : > { %v289_v63 = vcvt.f32.s32 %v288_v61 }
 0x1fb   : > { %v292_v0 = vadd.s32 %v291_v62, %v289_v63 }
 0x1fd   : > { %vm299_vm6 = vcmp.eq.s32.totalorder %v666_v34, %v292_v0  ;;  %v297_v36 = vsel %vm293_vm11, %v292_v0, 0  ;;  %vm445_vm11 = vcmask 31744  }
 0x1fe   : > { %v301_v1 = vsel %vm299_vm6, inf, %v249_v31 }
 0x1ff   : > { %v305_v2 = vsel %vm252_vm0, %v301_v1, inf }
 0x200   : > { %306 = vmin.xlane.f32.xlu0 %v305_v2 }
 0x26b   : > { %v304_v3 = vpop.xlane.xlu2 %303 }
 0x26c   : > { %vm308_vm7 = vcmp.eq.f32.partialorder %v300_v59, %v304_v3 }
 0x26d   : > { %v310_v4 = vsel %vm308_vm7, %v666_v34, 64 }
 0x26e   : > { %v312_v5 = vsel %vm252_vm0, %v310_v4, 2147483647 }
 0x26f   : > { %v314_v6 = vshra.s32 %v312_v5, 16  ;;  %v313_v13 = vand.u32 65535, %v312_v5 }
 0x271   : > { %v316_v7 = vcvt.s32.f32 %v314_v6  ;;  %v315_v15 = vcvt.s32.f32 %v313_v13 }
 0x273   : > { %317 = vmin.xlane.f32.xlu1 %v316_v7  ;;  %v307_v8 = vpop.xlane.xlu0 %306 }
 0x274   : > { %vm309_vm8 = vcmp.eq.f32.partialorder %v301_v1, %v307_v8 }
 0x275   : > { %v311_v9 = vsel %vm309_vm8, %v666_v34, 64 }
 0x276   : > { %v327_v10 = vsel %vm252_vm0, %v311_v9, 2147483647 }
 0x277   : > { %v329_v11 = vshra.s32 %v327_v10, 16  ;;  %v328_v17 = vand.u32 65535, %v327_v10 }
 0x279   : > { %v331_v12 = vcvt.s32.f32 %v329_v11  ;;  %v330_v19 = vcvt.s32.f32 %v328_v17 }
 0x27b   : > { %332 = vmin.xlane.f32.xlu2 %v331_v12 }
 0x2e6   : > { %v318_v14 = vpop.xlane.xlu1 %317 }
 0x2e7   : > { %vm319_vm9 = vcmp.eq.f32.partialorder %v316_v7, %v318_v14  ;;  %v324_v21 = vcvt.f32.s32 %v318_v14 }
 0x2e8   : > { %v320_v16 = vsel %vm319_vm9, %v315_v15, inf }
 0x2e9   : > { %321 = vmin.xlane.f32.xlu0 %v320_v16  ;;  %v325_v23 = vshll.u32 %v324_v21, 16 }
 0x2ee   : > { %v333_v18 = vpop.xlane.xlu2 %332 }
 0x2ef   : > { %vm334_vm10 = vcmp.eq.f32.partialorder %v331_v12, %v333_v18  ;;  %v339_v27 = vcvt.f32.s32 %v333_v18 }
 0x2f0   : > { %v335_v20 = vsel %vm334_vm10, %v330_v19, inf }
 0x2f1   : > { %336 = vmin.xlane.f32.xlu1 %v335_v20  ;;  %v340_v32 = vshll.u32 %v339_v27, 16 }
 0x35c   : > { %v322_v22 = vpop.xlane.xlu0 %321 }
 0x35d   : > { %v323_v24 = vcvt.f32.s32 %v322_v22 }
 0x35f   : > { %v326_v25 = vadd.s32 %v325_v23, %v323_v24 }
 0x361   : > { %v345_v28 = vsel %vm342_vm12, %v326_v25, %v296_v26  ;;  %vm347_vm13 = vcmp.eq.s32.totalorder %v666_v34, %v326_v25 }
 0x362   : > { %v349_v29 = vsel %vm347_vm13, inf, %v300_v59 }
 0x363   : > { %v351_v30 = vsel %vm252_vm0, %v349_v29, inf }
 0x364   : > { %v337_v31 = vpop.xlane.xlu1 %336  ;;  %352 = vmin.xlane.f32.xlu2 %v351_v30 }
 0x365   : > { %v338_v33 = vcvt.f32.s32 %v337_v31 }
 0x367   : > { %v341_v35 = vadd.s32 %v340_v32, %v338_v33 }
 0x369   : > { %v346_v37 = vsel %vm342_vm12, %v341_v35, %v297_v36  ;;  %vm348_vm14 = vcmp.eq.s32.totalorder %v666_v34, %v341_v35 }
 0x36a   : > { %v350_v38 = vsel %vm348_vm14, inf, %v301_v1 }
 0x36b   : > { %v354_v39 = vsel %vm252_vm0, %v350_v38, inf }
 0x36c   : > { %355 = vmin.xlane.f32.xlu0 %v354_v39 }
 0x3d7   : > { %v353_v40 = vpop.xlane.xlu2 %352 }
 0x3d8   : > { %vm357_vm15 = vcmp.eq.f32.partialorder %v349_v29, %v353_v40 }
 0x3d9   : > { %v359_v41 = vsel %vm357_vm15, %v666_v34, 64 }
 0x3da   : > { %v361_v42 = vsel %vm252_vm0, %v359_v41, 2147483647 }
 0x3db   : > { %v363_v43 = vshra.s32 %v361_v42, 16  ;;  %v362_v50 = vand.u32 65535, %v361_v42 }
 0x3dd   : > { %v365_v44 = vcvt.s32.f32 %v363_v43  ;;  %v364_v52 = vcvt.s32.f32 %v362_v50 }
 0x3df   : > { %366 = vmin.xlane.f32.xlu1 %v365_v44  ;;  %v356_v45 = vpop.xlane.xlu0 %355 }
 0x3e0   : > { %vm358_vm1 = vcmp.eq.f32.partialorder %v350_v38, %v356_v45 }
 0x3e1   : > { %v360_v46 = vsel %vm358_vm1, %v666_v34, 64 }
 0x3e2   : > { %v376_v47 = vsel %vm252_vm0, %v360_v46, 2147483647 }
 0x3e3   : > { %v378_v48 = vshra.s32 %v376_v47, 16  ;;  %v377_v54 = vand.u32 65535, %v376_v47 }
 0x3e5   : > { %v380_v49 = vcvt.s32.f32 %v378_v48  ;;  %v379_v56 = vcvt.s32.f32 %v377_v54 }
 0x3e7   : > { %381 = vmin.xlane.f32.xlu2 %v380_v49 }
 0x452   : > { %v367_v51 = vpop.xlane.xlu1 %366 }
 0x453   : > { %vm368_vm2 = vcmp.eq.f32.partialorder %v365_v44, %v367_v51  ;;  %v373_v58 = vcvt.f32.s32 %v367_v51 }
 0x454   : > { %v369_v53 = vsel %vm368_vm2, %v364_v52, inf }
 0x455   : > { %370 = vmin.xlane.f32.xlu0 %v369_v53  ;;  %v374_v60 = vshll.u32 %v373_v58, 16 }
 0x45a   : > { %v382_v55 = vpop.xlane.xlu2 %381 }
 0x45b   : > { %vm383_vm3 = vcmp.eq.f32.partialorder %v380_v49, %v382_v55  ;;  %v388_v63 = vcvt.f32.s32 %v382_v55 }
 0x45c   : > { %v384_v57 = vsel %vm383_vm3, %v379_v56, inf }
 0x45d   : > { %385 = vmin.xlane.f32.xlu1 %v384_v57  ;;  %v389_v4 = vshll.u32 %v388_v63, 16 }
 0x4c8   : > { %v371_v59 = vpop.xlane.xlu0 %370 }
 0x4c9   : > { %v372_v61 = vcvt.f32.s32 %v371_v59 }
 0x4cb   : > { %v375_v62 = vadd.s32 %v374_v60, %v372_v61 }
 0x4cd   : > { %v394_v0 = vsel %vm391_vm4, %v375_v62, %v345_v28  ;;  %vm396_vm5 = vcmp.eq.s32.totalorder %v666_v34, %v375_v62 }
 0x4ce   : > { %v398_v1 = vsel %vm396_vm5, inf, %v349_v29 }
 0x4cf   : > { %v400_v2 = vsel %vm252_vm0, %v398_v1, inf }
 0x4d0   : > { %v386_v3 = vpop.xlane.xlu1 %385  ;;  %401 = vmin.xlane.f32.xlu2 %v400_v2 }
 0x4d1   : > { %v387_v5 = vcvt.f32.s32 %v386_v3 }
 0x4d3   : > { %v390_v6 = vadd.s32 %v389_v4, %v387_v5 }
 0x4d5   : > { %v395_v7 = vsel %vm391_vm4, %v390_v6, %v346_v37  ;;  %vm397_vm6 = vcmp.eq.s32.totalorder %v666_v34, %v390_v6 }
 0x4d6   : > { %v399_v8 = vsel %vm397_vm6, inf, %v350_v38 }
 0x4d7   : > { %v403_v9 = vsel %vm252_vm0, %v399_v8, inf }
 0x4d8   : > { %404 = vmin.xlane.f32.xlu0 %v403_v9 }
 0x543   : > { %v402_v10 = vpop.xlane.xlu2 %401 }
 0x544   : > { %vm406_vm7 = vcmp.eq.f32.partialorder %v398_v1, %v402_v10 }
 0x545   : > { %v408_v11 = vsel %vm406_vm7, %v666_v34, 64 }
 0x546   : > { %v410_v12 = vsel %vm252_vm0, %v408_v11, 2147483647 }
 0x547   : > { %v412_v13 = vshra.s32 %v410_v12, 16  ;;  %v411_v20 = vand.u32 65535, %v410_v12 }
 0x549   : > { %v414_v14 = vcvt.s32.f32 %v412_v13  ;;  %v413_v22 = vcvt.s32.f32 %v411_v20 }
 0x54b   : > { %415 = vmin.xlane.f32.xlu1 %v414_v14  ;;  %v405_v15 = vpop.xlane.xlu0 %404 }
 0x54c   : > { %vm407_vm8 = vcmp.eq.f32.partialorder %v399_v8, %v405_v15 }
 0x54d   : > { %v409_v16 = vsel %vm407_vm8, %v666_v34, 64 }
 0x54e   : > { %v425_v17 = vsel %vm252_vm0, %v409_v16, 2147483647  ;;  %vm440_vm0 = vcmp.eq.s32.totalorder %v666_v34, 3 }
 0x54f   : > { %v427_v18 = vshra.s32 %v425_v17, 16  ;;  %v426_v24 = vand.u32 65535, %v425_v17 }
 0x551   : > { %v429_v19 = vcvt.s32.f32 %v427_v18  ;;  %v428_v26 = vcvt.s32.f32 %v426_v24 }
 0x553   : > { %430 = vmin.xlane.f32.xlu2 %v429_v19 }
 0x5be   : > { %v416_v21 = vpop.xlane.xlu1 %415 }
 0x5bf   : > { %vm417_vm9 = vcmp.eq.f32.partialorder %v414_v14, %v416_v21  ;;  %v422_v28 = vcvt.f32.s32 %v416_v21 }
 0x5c0   : > { %v418_v23 = vsel %vm417_vm9, %v413_v22, inf }
 0x5c1   : > { %419 = vmin.xlane.f32.xlu0 %v418_v23  ;;  %v423_v30 = vshll.u32 %v422_v28, 16 }
 0x5c6   : > { %v431_v25 = vpop.xlane.xlu2 %430 }
 0x5c7   : > { %vm432_vm10 = vcmp.eq.f32.partialorder %v429_v19, %v431_v25  ;;  %v437_v33 = vcvt.f32.s32 %v431_v25 }
 0x5c8   : > { %v433_v27 = vsel %vm432_vm10, %v428_v26, inf }
 0x5c9   : > { %434 = vmin.xlane.f32.xlu1 %v433_v27  ;;  %v438_v37 = vshll.u32 %v437_v33, 16 }
 0x634   : > { %v420_v29 = vpop.xlane.xlu0 %419 }
 0x635   : > { %v421_v31 = vcvt.f32.s32 %v420_v29 }
 0x637   : > { %v424_v32 = vadd.s32 %v423_v30, %v421_v31 }
 0x639   : > { %v443_v35 = vsel %vm440_vm0, %v424_v32, %v394_v0 }
 0x63a   : > { %446 = vst.msk [vmem:[%s198_s23] sm:$0xff] %vm445_vm11, %v443_v35 }
 0x63c   : > { %v435_v36 = vpop.xlane.xlu1 %434 }
 0x63d   : > { %v436_v38 = vcvt.f32.s32 %v435_v36 }
 0x63f   : > { %v439_v39 = vadd.s32 %v438_v37, %v436_v38 }
 0x641   : > { %v444_v40 = vsel %vm440_vm0, %v439_v39, %v395_v7 }
 0x642   : > { %447 = vst.msk [vmem:[%s198_s23 + $0x8] sm:$0xff] %vm445_vm11, %v444_v40 }
 0x643 PF: > { %s12_s11 = sadd.s32 1, %s614_s11   ;;  %s721_s9 = smov %s610_s10 }
 0x644   : > { %p9_p5 = scmp.ge.s32.totalorder %s12_s11, 6   ;;  %s722_s10 = smov %s724_s12 }
 0x646   :  { %11 = sbr.rel (!%p9_p5) target bundleno = 2 (0x2), region = 61 }

// kernel: construct_graph.2
= control target key start
LH: loop header
LB: loop body
LE: loop exit
PB: predicated region body
PF: predicated region fallthrough
CT: control target
= control target key end

     0   :  { %s427_s6 = smov 0   ;;  %s512_s0 = inlined_call_operand.vmem [shape: f32[4,3,64], index: 0, kind: input, shape index: {}]   ;;  %s513_s1 = inlined_call_operand.vmem [shape: s32[4,1,16], index: 1, kind: output, shape index: {}]  }
   0x1 LB: > { %s311_s7 = sadd.s32 4294967295, %s395_s6   ;;  %p315_p0 = scmp.ge.s32.totalorder %s395_s6, 1  ;;  %s395_s6 = sphi %s427_s6, %s11_s6  }
   0x2   : > { %p88_p1 = scmp.lt.s32.totalorder %s395_s6, 3 }
   0x4   : > { %p89_p2 = pnand %p315_p0, %p88_p1 }
   0x5   : > { %s316_s8 = sshll.u32 (!%p89_p2), %s311_s7, 1  ;;  %s457_s16 = smov (!%p89_p2), 1  }
   0x6   : > { %92 = sbr.rel (%p89_p2) target bundleno = 530 (0x212), region = 24  ;;  %p108_p3 = scmp.lt.s32.totalorder (!%p89_p2), %s316_s8, 3 }
   0xb   : > { %v120_v0 = vlaneseq  ;;  %s516_s8 = smov (!%p108_p3, %s316_s8), 3  ;;  %v449_v4 = vmov 0   ;;  %v451_v5 = vmov inf   ;;  %v453_v6 = vmov inf  }
   0xc   : > { %s317_s9 = sshll.u32 %s516_s8, 2  ;;  %s440_s12 = scalar_lea.vmem %s513_s1, %s516_s8  ;;  %v455_v7 = vmov 0  }
   0xd   : > { %v435_v1 = vand.u32 127, %v120_v0  ;;  %s111_s15 = scalar_lea.vmem %s512_s0, %s317_s9 }
   0xe   : > { %v445_v2 = vld [vmem:[%s111_s15] sm:$0x7]  ;;  %v447_v3 = vld [vmem:[%s111_s15 + $0x4] sm:$0x7] }
   0xf LB: >> { %v135_v8 = vrot.slane %v447_v3, 7  ;;  %vm136_vm0 = vcmask 1041409   ;;  %vm140_vm1 = vcmask 517120   ;;  %v151_v9 = vrot.slane %v445_v2, 2  ;;  %s415_s16 = sphi %s457_s16, %s127_s16   ;;  %v411_v7 = vphi %v455_v7, %v234_v7   ;;  %v407_v6 = vphi %v453_v6, %v200_v6   ;;  %v403_v5 = vphi %v451_v5, %v201_v5   ;;  %v399_v4 = vphi %v449_v4, %v514_v4  }
  0x10   : >> { %v152_v10 = vrot.slane %v447_v3, 1  ;;  %v144_v11 = vrot.slane %v445_v2, 1  ;;  %vm132_vm2 = vcmp.eq.s32.totalorder %v435_v1, %v411_v7  ;;  %v235_v7 = vstv %s415_s16  ;;  %s127_s16 = sadd.s32 1, %s415_s16  }
  0x11   : >> { %v137_v12 = vsel %vm136_vm0, %v135_v8, %v445_v2  ;;  %vm236_vm6 = vcmp.eq.s32.totalorder %v435_v1, %v235_v7  ;;  %p124_p4 = scmp.ge.s32.totalorder %s127_s16, 16  }
  0x12   : >> { %v139_v13 = vsel %vm132_vm2, %v137_v12, 0.0  ;;  %v153_v14 = vsel %vm136_vm0, %v152_v10, %v151_v9  ;;  %v145_v17 = vsel %vm136_vm0, %v447_v3, %v144_v11  ;;  %vm241_vm7 = vcmask (%p124_p4), 122880  }
  0x13   : >> { %v141_v15 = vsel %vm140_vm1, %v139_v13, 0.0  ;;  %v155_v16 = vsel %vm132_vm2, %v153_v14, 0.0  ;;  %v147_v19 = vsel %vm132_vm2, %v145_v17, 0.0 }
  0x14   : >> { %142 = vadd.xlane.f32.xlu0 %v141_v15  ;;  %v156_v18 = vsel %vm140_vm1, %v155_v16, 0.0  ;;  %v148_v20 = vsel %vm140_vm1, %v147_v19, 0.0 }
  0x15   : >> { %157 = vadd.xlane.f32.xlu1 %v156_v18 }
  0x1c   : >> { %149 = vadd.xlane.f32.xlu0 %v148_v20 }
  0x87   : >> { %v143_v21 = vpop.xlane.xlu0 %142 }
  0x88   : >> { %v158_v22 = vpop.xlane.xlu1 %157  ;;  %v160_v24 = vrot.slane %v143_v21, 1  ;;  %v163_v33 = vsub.f32 %v445_v2, %v143_v21 }
  0x89   : >> { %v173_v23 = vrot.slane %v158_v22, 7  ;;  %v172_v25 = vrot.slane %v158_v22, 6 }
  0x8a   : >> { %v164_v27 = vsub.f32 %v447_v3, %v160_v24  ;;  %v178_v41 = vmul.f32 %v163_v33, %v163_v33 }
  0x8b   : >> { %v177_v26 = vsub.f32 %v447_v3, %v173_v23  ;;  %v176_v29 = vsub.f32 %v445_v2, %v172_v25 }
  0x8c   : >> { %v179_v36 = vmul.f32 %v164_v27, %v164_v27 }
  0x8d   : >> { %v191_v30 = vmul.f32 %v177_v26, %v177_v26  ;;  %v190_v37 = vmul.f32 %v176_v29, %v176_v29 }
  0x8f   : >> { %v150_v28 = vpop.xlane.xlu0 %149  ;;  %v195_v38 = vrot.slane %v191_v30, 2  ;;  %v194_v44 = vrot.slane %v190_v37, 2 }
  0x90   : >> { %v166_v31 = vrot.slane %v150_v28, 7  ;;  %v170_v32 = vsub.f32 %v447_v3, %v150_v28 }
  0x92   : >> { %v169_v34 = vsub.f32 %v445_v2, %v166_v31  ;;  %v181_v35 = vmul.f32 %v170_v32, %v170_v32 }
  0x94   : >> { %v180_v39 = vmul.f32 %v169_v34, %v169_v34  ;;  %v185_v40 = vrot.slane %v181_v35, 1 }
  0x96   : >> { %v184_v42 = vrot.slane %v180_v39, 1  ;;  %v189_v43 = vadd.f32 %v185_v40, %v179_v36 }
  0x98   : >> { %v188_v45 = vadd.f32 %v184_v42, %v178_v41  ;;  %v199_v46 = vadd.f32 %v195_v38, %v189_v43 }
  0x9a   : >> { %v198_v47 = vadd.f32 %v194_v44, %v188_v45  ;;  %v201_v5 = vmin.f32 %v403_v5, %v199_v46  }
  0x9c   : >> { %v200_v6 = vmin.f32 %v407_v6, %v198_v47   ;;  %v204_v48 = vrot.slane %v201_v5, 7 }
  0x9e   : >> { %v205_v49 = vsel %vm136_vm0, %v204_v48, %v200_v6 }
  0x9f   : >> { %v207_v50 = vsel %vm140_vm1, %v205_v49, -inf }
  0xa0   : >> { %208 = vmax.xlane.f32.xlu1 %v207_v50 }
 0x113   : >> { %v209_v51 = vpop.xlane.xlu1 %208 }
 0x114   : >> { %v211_v52 = vrot.slane %v209_v51, 1  ;;  %vm214_vm3 = vcmp.eq.f32.partialorder %v200_v6, %v209_v51 }
 0x115   : >> { %v216_v55 = vsel %vm214_vm3, %v435_v1, 64 }
 0x116   : >> { %vm215_vm4 = vcmp.eq.f32.partialorder %v201_v5, %v211_v52 }
 0x117   : >> { %v217_v53 = vsel %vm215_vm4, %v435_v1, 64 }
 0x118   : >> { %v218_v54 = vrot.slane %v217_v53, 7 }
 0x11a   : >> { %v219_v56 = vsel %vm136_vm0, %v218_v54, %v216_v55 }
 0x11b   : >> { %v220_v57 = vsel %vm140_vm1, %v219_v56, 2147483647 }
 0x11c   : >> { %v222_v58 = vshra.s32 %v220_v57, 16  ;;  %v221_v60 = vand.u32 65535, %v220_v57 }
 0x11e   : >> { %v224_v59 = vcvt.s32.f32 %v222_v58  ;;  %v223_v62 = vcvt.s32.f32 %v221_v60 }
 0x120   : >> { %225 = vmin.xlane.f32.xlu2 %v224_v59 }
 0x193   : >> { %v226_v61 = vpop.xlane.xlu2 %225 }
 0x194   : >> { %vm227_vm5 = vcmp.eq.f32.partialorder %v224_v59, %v226_v61  ;;  %v232_v0 = vcvt.f32.s32 %v226_v61 }
 0x195   : >> { %v228_v63 = vsel %vm227_vm5, %v223_v62, inf }
 0x196   : >> { %229 = vmin.xlane.f32.xlu2 %v228_v63  ;;  %v233_v9 = vshll.u32 %v232_v0, 16 }
 0x209   : >> { %v230_v8 = vpop.xlane.xlu2 %229 }
 0x20a   : >> { %v231_v10 = vcvt.f32.s32 %v230_v8 }
 0x20b   : > { %126 = sbr.rel (!%p124_p4) target bundleno = 15 (0xf), region = 61 }
 0x20c   : >> { %v234_v7 = vadd.s32 %v233_v9, %v231_v10  }
 0x20e   : >> { %v239_v11 = vsel %vm236_vm6, %v234_v7, %v399_v4  }
 0x20f   : >> { %v514_v4 = vmov %v239_v11  ;;  %v240_v12 = vrot.slane (%p124_p4), %v239_v11, 1  ;;  %242 = vst.msk [vmem:[%s440_s12] sm:$0x1] (%p124_p4), %vm241_vm7, %v239_v11 }
 0x211   : > { %243 = vst.msk [vmem:[%s440_s12 + $0x1] sm:$0x1] %vm241_vm7, %v240_v12 }
 0x212 PF: > { %s11_s6 = sadd.s32 1, %s395_s6  }
 0x213   : > { %p8_p5 = scmp.ge.s32.totalorder %s11_s6, 4  }
 0x215   :  { %10 = sbr.rel (!%p8_p5) target bundleno = 1 (0x1), region = 72 }

</bundles_post_ra>
